<compile_context>
chip_gen: v7x
topology: tpu7x:2x2x1
jax: 0.10.0
libtpu: 0.0.40
codegen_flags: <defaults>
</compile_context>

<pallas_src>
import functools

import jax
import jax.numpy as jnp
from jax.experimental import pallas as pl
from jax.experimental.pallas import tpu as pltpu


# ---------------------------------------------------------------------------
# Fused Pallas kernel: t1 -> LAYER_NUM x FALayer -> t2
# ---------------------------------------------------------------------------
def _fused_fagcn_kernel(bg_ref, x_ref, w1_ref, b1_ref, wg_ref, eb_ref,
                        w2_ref, b2_ref, o_ref, *, eps, layer_num):
    # t1 + relu   (dropout(x) == identity at inference)
    h = jnp.dot(x_ref[...], w1_ref[...], preferred_element_type=jnp.float32)
    h = jnp.maximum(h + b1_ref[...], 0.0)                       # [N, H]
    raw = h                                                      # kept in VMEM/regs

    # layer-invariant masked normalization adj * d_dst * d_src, loaded & cast once
    e_base = eb_ref[...].astype(jnp.float32)                     # [N_dst, N_src]

    for l in range(layer_num):                                   # static unroll (small L)
        # gate projection hoisted: one [N,2]-output matmul per layer
        gparts = jnp.dot(h, wg_ref[l], preferred_element_type=jnp.float32)  # [N, 2]
        gd = gparts[:, 0:1]                                      # dst contribution [N,1]
        gs = gparts[:, 1:2]                                      # src contribution [N,1]
        g = jnp.tanh(gd + gs.T + bg_ref[l])                      # [N_dst, N_src]
        e = (g * e_base).astype(jnp.bfloat16)                    # masked edge weights
        # TODO(synk): training-mode dropout on `e` omitted (identity at inference).
        z = jnp.dot(e, h.astype(jnp.bfloat16),
                    preferred_element_type=jnp.float32)          # [N, H], bf16 MXU, f32 acc
        h = eps * raw + z

    # t2
    o_ref[...] = jnp.dot(h, w2_ref[...],
                         preferred_element_type=jnp.float32) + b2_ref[...]


def fagcn_forward(params, x, e_base, *, eps, layer_num):
    n = x.shape[0]
    hdim = params["w1"].shape[1]
    wg = params["wg"]                        # [L, H, 2]
    bg = params["bg"]                        # [L]

    def vmem_spec(shape):
        return pl.BlockSpec(shape, lambda i, _s=shape: (0,) * len(_s))

    return pl.pallas_call(
        functools.partial(_fused_fagcn_kernel, eps=eps, layer_num=layer_num),
        out_shape=jax.ShapeDtypeStruct((n, hdim), jnp.float32),
        grid=(1,),
        in_specs=[
            pl.BlockSpec(memory_space=pltpu.MemorySpace.SMEM),   # bg scalars -> SMEM
            vmem_spec(x.shape),
            vmem_spec(params["w1"].shape),
            vmem_spec(params["b1"].shape),
            vmem_spec(wg.shape),
            vmem_spec(e_base.shape),
            vmem_spec(params["w2"].shape),
            vmem_spec(params["b2"].shape),
        ],
        out_specs=vmem_spec((n, hdim)),
        compiler_params=pltpu.CompilerParams(
            dimension_semantics=("arbitrary",),
        ),
    )(bg, x, params["w1"], params["b1"], wg, e_base, params["w2"], params["b2"])


# ---------------------------------------------------------------------------
# Plain-JAX glue: graph preprocessing and parameter init
# ---------------------------------------------------------------------------
def build_graph(edge_index, num_nodes):
    """dgl.graph -> to_simple -> remove_self_loop -> in_degrees^-0.5 -> e_base."""
    src, dst = edge_index[0], edge_index[1]
    adj = jnp.zeros((num_nodes, num_nodes), jnp.float32)
    adj = adj.at[dst, src].set(1.0)                              # dedup (to_simple)
    adj = adj * (1.0 - jnp.eye(num_nodes, dtype=jnp.float32))    # remove self loops
    deg = jnp.maximum(adj.sum(axis=1), 1.0)                      # in-degree, clamp(min=1)
    norm = deg ** -0.5                                           # d
    # layer-invariant edge normalization, computed once; bf16 halves HBM traffic.
    e_base = (adj * norm[:, None] * norm[None, :]).astype(jnp.bfloat16)
    return e_base


def init_params(key, in_dim, hidden_dim, layer_num):
    ks = jax.random.split(key, 4 + 2 * layer_num)
    gain = 1.414

    # t1: xavier_normal weight, default-uniform bias
    std1 = gain * (2.0 / (in_dim + hidden_dim)) ** 0.5
    w1 = jax.random.normal(ks[0], (in_dim, hidden_dim), jnp.float32) * std1
    bnd1 = 1.0 / in_dim ** 0.5
    b1 = jax.random.uniform(ks[1], (1, hidden_dim), jnp.float32, -bnd1, bnd1)

    # t2: PyTorch default Linear init
    bnd2 = 1.0 / hidden_dim ** 0.5
    w2 = jax.random.uniform(ks[2], (hidden_dim, hidden_dim), jnp.float32, -bnd2, bnd2)
    b2 = jax.random.uniform(ks[3], (1, hidden_dim), jnp.float32, -bnd2, bnd2)

    # gate layers: xavier_normal weight, default-uniform bias
    stdg = gain * (2.0 / (2 * hidden_dim + 1)) ** 0.5
    bndg = 1.0 / (2 * hidden_dim) ** 0.5
    wgs, bgs = [], []
    for i in range(layer_num):
        wg_full = jax.random.normal(ks[4 + 2 * i], (2 * hidden_dim,), jnp.float32) * stdg
        # column 0: weights on dst half, column 1: weights on src half
        wgs.append(jnp.stack([wg_full[:hidden_dim], wg_full[hidden_dim:]], axis=1))
        bgs.append(jax.random.uniform(ks[5 + 2 * i], (), jnp.float32, -bndg, bndg))
    wg = jnp.stack(wgs, axis=0)                                  # [L, H, 2]
    bg = jnp.stack(bgs, axis=0)                                  # [L]

    return dict(w1=w1, b1=b1, w2=w2, b2=b2, wg=wg, bg=bg)


# ---------------------------------------------------------------------------
if __name__ == "__main__":
    N, IN_DIM, HIDDEN, LAYER_NUM, EPS = 16, 8, 32, 2, 0.3

    key = jax.random.PRNGKey(0)
    kx, ke1, ke2, kp = jax.random.split(key, 4)

    x = jax.random.normal(kx, (N, IN_DIM), jnp.float32)
    E = 48
    src = jax.random.randint(ke1, (E,), 0, N)
    dst = jax.random.randint(ke2, (E,), 0, N)
    edge_index = jnp.stack([src, dst])

    e_base = build_graph(edge_index, N)
    params = init_params(kp, IN_DIM, HIDDEN, LAYER_NUM)

    fwd = jax.jit(functools.partial(fagcn_forward, eps=EPS, layer_num=LAYER_NUM))
    out = jax.block_until_ready(fwd(params, x, e_base))

    assert out.shape == (N, HIDDEN)
    assert bool(jnp.all(jnp.isfinite(out)))
    print("KERNEL_OK")
</pallas_src>

<mosaic_0001>
module attributes {stable_mosaic.version = 11 : i64} {
  func.func @_fused_fagcn_kernel(%arg0: i32, %arg1: memref<2xf32, #tpu.memory_space<smem>>, %arg2: memref<16x8xf32, #tpu.memory_space<vmem>>, %arg3: memref<8x32xf32, #tpu.memory_space<vmem>>, %arg4: memref<1x32xf32, #tpu.memory_space<vmem>>, %arg5: memref<2x32x2xf32, #tpu.memory_space<vmem>>, %arg6: memref<16x16xbf16, #tpu.memory_space<vmem>>, %arg7: memref<32x32xf32, #tpu.memory_space<vmem>>, %arg8: memref<1x32xf32, #tpu.memory_space<vmem>>, %arg9: memref<16x32xf32, #tpu.memory_space<vmem>>) attributes {dimension_semantics = [#tpu.dimension_semantics<arbitrary>], iteration_bounds = array<i64: 1>, scalar_prefetch = 0 : i64, scratch_operands = 0 : i64, tpu.core_type = #tpu.core_type<tc>, window_params = [{transform_indices = @transform_0, window_bounds = array<i64: 2>}, {pipeline_mode = #tpu.pipeline_mode<synchronous>, transform_indices = @transform_1, window_bounds = array<i64: 16, 8>}, {pipeline_mode = #tpu.pipeline_mode<synchronous>, transform_indices = @transform_2, window_bounds = array<i64: 8, 32>}, {pipeline_mode = #tpu.pipeline_mode<synchronous>, transform_indices = @transform_3, window_bounds = array<i64: 1, 32>}, {pipeline_mode = #tpu.pipeline_mode<synchronous>, transform_indices = @transform_4, window_bounds = array<i64: 2, 32, 2>}, {pipeline_mode = #tpu.pipeline_mode<synchronous>, transform_indices = @transform_5, window_bounds = array<i64: 16, 16>}, {pipeline_mode = #tpu.pipeline_mode<synchronous>, transform_indices = @transform_6, window_bounds = array<i64: 32, 32>}, {pipeline_mode = #tpu.pipeline_mode<synchronous>, transform_indices = @transform_7, window_bounds = array<i64: 1, 32>}, {pipeline_mode = #tpu.pipeline_mode<synchronous>, transform_indices = @transform_8, window_bounds = array<i64: 16, 32>}]} {
    %c0 = arith.constant 0 : index
    %c0_0 = arith.constant 0 : index
    %0 = vector.load %arg2[%c0, %c0_0] : memref<16x8xf32, #tpu.memory_space<vmem>>, vector<16x8xf32>
    %c0_1 = arith.constant 0 : index
    %c0_2 = arith.constant 0 : index
    %1 = vector.load %arg3[%c0_1, %c0_2] : memref<8x32xf32, #tpu.memory_space<vmem>>, vector<8x32xf32>
    %cst = arith.constant dense<0.000000e+00> : vector<16x32xf32>
    %2 = tpu.matmul %0, %1, %cst {dimension_numbers = #tpu.dot_dimension_numbers<[1], [0], [0], [1], [0, 0, 1, 1], [], []>} : vector<16x8xf32>, vector<8x32xf32>, vector<16x32xf32> -> vector<16x32xf32>
    %c0_3 = arith.constant 0 : index
    %c0_4 = arith.constant 0 : index
    %3 = vector.load %arg4[%c0_3, %c0_4] : memref<1x32xf32, #tpu.memory_space<vmem>>, vector<1x32xf32>
    %4 = vector.broadcast %3 : vector<1x32xf32> to vector<16x32xf32>
    %5 = arith.addf %2, %4 : vector<16x32xf32>
    %cst_5 = arith.constant 0.000000e+00 : f32
    %6 = vector.broadcast %cst_5 : f32 to vector<16x32xf32>
    %7 = arith.maximumf %5, %6 : vector<16x32xf32>
    %c0_6 = arith.constant 0 : index
    %c0_7 = arith.constant 0 : index
    %8 = vector.load %arg6[%c0_6, %c0_7] : memref<16x16xbf16, #tpu.memory_space<vmem>>, vector<16x16xbf16>
    %9 = arith.extf %8 : vector<16x16xbf16> to vector<16x16xf32>
    %c0_8 = arith.constant 0 : index
    %c0_9 = arith.constant 0 : index
    %c0_10 = arith.constant 0 : index
    %10 = vector.load %arg5[%c0_8, %c0_9, %c0_10] : memref<2x32x2xf32, #tpu.memory_space<vmem>>, vector<1x32x2xf32>
    %11 = vector.shape_cast %10 : vector<1x32x2xf32> to vector<32x2xf32>
    %cst_11 = arith.constant dense<0.000000e+00> : vector<16x2xf32>
    %12 = tpu.matmul %7, %11, %cst_11 {dimension_numbers = #tpu.dot_dimension_numbers<[1], [0], [0], [1], [0, 0, 1, 1], [], []>} : vector<16x32xf32>, vector<32x2xf32>, vector<16x2xf32> -> vector<16x2xf32>
    %13 = vector.extract_strided_slice %12 {offsets = [0, 0], sizes = [16, 1], strides = [1, 1]} : vector<16x2xf32> to vector<16x1xf32>
    %14 = vector.extract_strided_slice %12 {offsets = [0, 1], sizes = [16, 1], strides = [1, 1]} : vector<16x2xf32> to vector<16x1xf32>
    %15 = tpu.transpose %14, [1, 0] : vector<16x1xf32> -> vector<1x16xf32>
    %16 = vector.broadcast %13 : vector<16x1xf32> to vector<16x16xf32>
    %17 = vector.broadcast %15 : vector<1x16xf32> to vector<16x16xf32>
    %18 = arith.addf %16, %17 : vector<16x16xf32>
    %c0_12 = arith.constant 0 : index
    %19 = memref.load %arg1[%c0_12] : memref<2xf32, #tpu.memory_space<smem>>
    %20 = vector.broadcast %19 : f32 to vector<16x16xf32>
    %21 = arith.addf %18, %20 : vector<16x16xf32>
    %22 = math.tanh %21 : vector<16x16xf32>
    %23 = arith.mulf %22, %9 : vector<16x16xf32>
    %24 = arith.truncf %23 : vector<16x16xf32> to vector<16x16xbf16>
    %25 = arith.truncf %7 : vector<16x32xf32> to vector<16x32xbf16>
    %cst_13 = arith.constant dense<0.000000e+00> : vector<16x32xf32>
    %26 = tpu.matmul %24, %25, %cst_13 {dimension_numbers = #tpu.dot_dimension_numbers<[1], [0], [0], [1], [0, 0, 1, 1], [], []>} : vector<16x16xbf16>, vector<16x32xbf16>, vector<16x32xf32> -> vector<16x32xf32>
    %cst_14 = arith.constant 3.000000e-01 : f32
    %27 = vector.broadcast %cst_14 : f32 to vector<16x32xf32>
    %28 = arith.mulf %27, %7 : vector<16x32xf32>
    %29 = arith.addf %28, %26 : vector<16x32xf32>
    %c1 = arith.constant 1 : index
    %c0_15 = arith.constant 0 : index
    %c0_16 = arith.constant 0 : index
    %30 = vector.load %arg5[%c1, %c0_15, %c0_16] : memref<2x32x2xf32, #tpu.memory_space<vmem>>, vector<1x32x2xf32>
    %31 = vector.shape_cast %30 : vector<1x32x2xf32> to vector<32x2xf32>
    %cst_17 = arith.constant dense<0.000000e+00> : vector<16x2xf32>
    %32 = tpu.matmul %29, %31, %cst_17 {dimension_numbers = #tpu.dot_dimension_numbers<[1], [0], [0], [1], [0, 0, 1, 1], [], []>} : vector<16x32xf32>, vector<32x2xf32>, vector<16x2xf32> -> vector<16x2xf32>
    %33 = vector.extract_strided_slice %32 {offsets = [0, 0], sizes = [16, 1], strides = [1, 1]} : vector<16x2xf32> to vector<16x1xf32>
    %34 = vector.extract_strided_slice %32 {offsets = [0, 1], sizes = [16, 1], strides = [1, 1]} : vector<16x2xf32> to vector<16x1xf32>
    %35 = tpu.transpose %34, [1, 0] : vector<16x1xf32> -> vector<1x16xf32>
    %36 = vector.broadcast %33 : vector<16x1xf32> to vector<16x16xf32>
    %37 = vector.broadcast %35 : vector<1x16xf32> to vector<16x16xf32>
    %38 = arith.addf %36, %37 : vector<16x16xf32>
    %c1_18 = arith.constant 1 : index
    %39 = memref.load %arg1[%c1_18] : memref<2xf32, #tpu.memory_space<smem>>
    %40 = vector.broadcast %39 : f32 to vector<16x16xf32>
    %41 = arith.addf %38, %40 : vector<16x16xf32>
    %42 = math.tanh %41 : vector<16x16xf32>
    %43 = arith.mulf %42, %9 : vector<16x16xf32>
    %44 = arith.truncf %43 : vector<16x16xf32> to vector<16x16xbf16>
    %45 = arith.truncf %29 : vector<16x32xf32> to vector<16x32xbf16>
    %cst_19 = arith.constant dense<0.000000e+00> : vector<16x32xf32>
    %46 = tpu.matmul %44, %45, %cst_19 {dimension_numbers = #tpu.dot_dimension_numbers<[1], [0], [0], [1], [0, 0, 1, 1], [], []>} : vector<16x16xbf16>, vector<16x32xbf16>, vector<16x32xf32> -> vector<16x32xf32>
    %cst_20 = arith.constant 3.000000e-01 : f32
    %47 = vector.broadcast %cst_20 : f32 to vector<16x32xf32>
    %48 = arith.mulf %47, %7 : vector<16x32xf32>
    %49 = arith.addf %48, %46 : vector<16x32xf32>
    %c0_21 = arith.constant 0 : index
    %c0_22 = arith.constant 0 : index
    %50 = vector.load %arg7[%c0_21, %c0_22] : memref<32x32xf32, #tpu.memory_space<vmem>>, vector<32x32xf32>
    %cst_23 = arith.constant dense<0.000000e+00> : vector<16x32xf32>
    %51 = tpu.matmul %49, %50, %cst_23 {dimension_numbers = #tpu.dot_dimension_numbers<[1], [0], [0], [1], [0, 0, 1, 1], [], []>} : vector<16x32xf32>, vector<32x32xf32>, vector<16x32xf32> -> vector<16x32xf32>
    %c0_24 = arith.constant 0 : index
    %c0_25 = arith.constant 0 : index
    %52 = vector.load %arg8[%c0_24, %c0_25] : memref<1x32xf32, #tpu.memory_space<vmem>>, vector<1x32xf32>
    %53 = vector.broadcast %52 : vector<1x32xf32> to vector<16x32xf32>
    %54 = arith.addf %51, %53 : vector<16x32xf32>
    %c0_26 = arith.constant 0 : index
    %c0_27 = arith.constant 0 : index
    %55 = vector.load %arg9[%c0_26, %c0_27] : memref<16x32xf32, #tpu.memory_space<vmem>>, vector<16x32xf32>
    tpu.vector_store %arg9[%c0_26, %c0_27], %54 {strides = array<i32>} : memref<16x32xf32, #tpu.memory_space<vmem>>, vector<16x32xf32>,
    return
  }
  func.func @transform_0(%arg0: i32) -> i32 {
    %c0_i32 = arith.constant 0 : i32
    %c0_i32_0 = arith.constant 0 : i32
    return %c0_i32 : i32
  }
  func.func @transform_1(%arg0: i32) -> (i32, i32) {
    %c0_i32 = arith.constant 0 : i32
    %c0_i32_0 = arith.constant 0 : i32
    %c0_i32_1 = arith.constant 0 : i32
    return %c0_i32, %c0_i32_0 : i32, i32
  }
  func.func @transform_2(%arg0: i32) -> (i32, i32) {
    %c0_i32 = arith.constant 0 : i32
    %c0_i32_0 = arith.constant 0 : i32
    %c0_i32_1 = arith.constant 0 : i32
    return %c0_i32, %c0_i32_0 : i32, i32
  }
  func.func @transform_3(%arg0: i32) -> (i32, i32) {
    %c0_i32 = arith.constant 0 : i32
    %c0_i32_0 = arith.constant 0 : i32
    %c0_i32_1 = arith.constant 0 : i32
    return %c0_i32, %c0_i32_0 : i32, i32
  }
  func.func @transform_4(%arg0: i32) -> (i32, i32, i32) {
    %c0_i32 = arith.constant 0 : i32
    %c0_i32_0 = arith.constant 0 : i32
    %c0_i32_1 = arith.constant 0 : i32
    %c0_i32_2 = arith.constant 0 : i32
    return %c0_i32, %c0_i32_0, %c0_i32_1 : i32, i32, i32
  }
  func.func @transform_5(%arg0: i32) -> (i32, i32) {
    %c0_i32 = arith.constant 0 : i32
    %c0_i32_0 = arith.constant 0 : i32
    %c0_i32_1 = arith.constant 0 : i32
    return %c0_i32, %c0_i32_0 : i32, i32
  }
  func.func @transform_6(%arg0: i32) -> (i32, i32) {
    %c0_i32 = arith.constant 0 : i32
    %c0_i32_0 = arith.constant 0 : i32
    %c0_i32_1 = arith.constant 0 : i32
    return %c0_i32, %c0_i32_0 : i32, i32
  }
  func.func @transform_7(%arg0: i32) -> (i32, i32) {
    %c0_i32 = arith.constant 0 : i32
    %c0_i32_0 = arith.constant 0 : i32
    %c0_i32_1 = arith.constant 0 : i32
    return %c0_i32, %c0_i32_0 : i32, i32
  }
  func.func @transform_8(%arg0: i32) -> (i32, i32) {
    %c0_i32 = arith.constant 0 : i32
    %c0_i32_0 = arith.constant 0 : i32
    %c0_i32_1 = arith.constant 0 : i32
    return %c0_i32, %c0_i32_0 : i32, i32
  }
}

</mosaic_0001>

<bundles_post_ra>
// kernel: fagcn_forward.1
= control target key start
LH: loop header
LB: loop body
LE: loop exit
PB: predicated region body
PF: predicated region fallthrough
CT: control target
= control target key end

     0   :  { %13 = vsyncpa [#allocation4], 0  ;;  %s960_s0 = inlined_call_operand.vmem [shape: f32[2], index: 0, kind: input, shape index: {}]   ;;  %s961_s1 = inlined_call_operand.vmem [shape: f32[16,8], index: 1, kind: input, shape index: {}]   ;;  %s962_s2 = inlined_call_operand.vmem [shape: f32[8,32], index: 2, kind: input, shape index: {}]   ;;  %s963_s3 = inlined_call_operand.vmem [shape: f32[1,32], index: 3, kind: input, shape index: {}]   ;;  %s964_s4 = inlined_call_operand.vmem [shape: f32[2,32,2], index: 4, kind: input, shape index: {}]   ;;  %s965_s5 = inlined_call_operand.vmem [shape: bf16[16,16], index: 5, kind: input, shape index: {}]   ;;  %s966_s6 = inlined_call_operand.vmem [shape: f32[32,32], index: 6, kind: input, shape index: {}]   ;;  %s967_s7 = inlined_call_operand.vmem [shape: f32[1,32], index: 7, kind: input, shape index: {}]   ;;  %s968_s8 = inlined_call_operand.hbm [shape: f32[16,32], index: 8, kind: output, shape index: {}]  }
   0x1   :  { %14 = vsyncpa [#allocation3], 0  ;;  %s21_s29 = sshll.u32 %s960_s0, 4  ;;  %s22_s29 = int_to_ptr.vmem [resolvable:$true] %s21_s29 }
   0x2   :  { %s786_s30 = scalar_lea.vmem %s22_s29, 16  ;;  %p791_p1 = scmp.lt.s32.totalorder %s22_s29, %s22_s29 }
   0x3   :  { %p787_p0 = scmp.ne.s32.totalorder %s22_s29, %s786_s30  ;;  %p792_p2 = scmp.lt.s32.totalorder %s786_s30, %s786_s30 }
   0x5   :  { %p793_p3 = por %p792_p2, %p791_p1 }
   0x7   :  { %p794_p4 = pnand %p793_p3, %p787_p0 }
   0x9   :  { %797 = shalt.err (!%p794_p4)
}
   0xa   :  { %s824_s9 = smov [#allocation2]  }
   0xb   :  { %24 = dma.vmem_to_smem %s22_s29, 16, %s824_s9, [#allocation4]  }
   0xc   :  { %820 = dma.done.wait [#allocation4], 16  }
   0xd   :  { %821 = vsyncadd [#allocation4], 4294967280 }
   0xe   :  { %42 = sfence }
   0xf   :  { %v46_v0 = vld [vmem:[%s962_s2] sm:$0xff]  ;;  %vm54_vm0 = vcmask 64512   ;;  %v45_v2 = vld [vmem:[%s961_s1 + $0x8] sm:$0xff]  ;;  %v144_v6 = vld [vmem:[%s964_s4 + $0x10] sm:$0xff]  ;;  %v825_v9 = vmov 0.0   ;;  %vm146_vm1 = vcmask 261120   ;;  %v276_v26 = vlaneseq }
  0x10   :  { %v44_v1 = vld [vmem:[%s961_s1] sm:$0xff]  ;;  %694 = vmatprep.subr.mxu0 %v46_v0  ;;  %v143_v4 = vld [vmem:[%s964_s4 + $0x8] sm:$0xff]  ;;  %v145_v7 = vld [vmem:[%s964_s4 + $0x18] sm:$0xff]  ;;  %v826_v18 = vmov 0   ;;  %s827_s23 = smov 127   ;;  %vm828_vm2 = vmmov 0  }
  0x11   :  { %696 = vmatprep.mubr.msk.f32.mxu0 %vm54_vm0, %v44_v1  ;;  %v142_v3 = vld [vmem:[%s964_s4] sm:$0xff]  ;;  %695 = vmatpush3.msra.mxu0 %v46_v0  ;;  %v748_v8 = vpack.c.bf16 %v145_v7, %v144_v6  ;;  %v655_v24 = vld [vmem:[%s964_s4 + $0x28] sm:$0xff]  ;;  %v277_v27 = vshrl.u32 %v276_v26, 7  ;;  %s282_s27 = sld [smem:[#allocation2]]  ;;  %vm292_vm3 = vcmask 130048   ;;  %v656_v46 = vld [vmem:[%s964_s4 + $0x30] sm:$0xff] }
  0x12   :  { %v744_v5 = vpack.c.bf16 %v143_v4, %v142_v3  ;;  %697 = vmatmul.mubr.msk.f32.vlgmr.msra.gmra.mrb[0].mxu0 %vm54_vm0, %v45_v2  ;;  %710 = vmatprep.subr.bf16.mxu0 %v825_v9  ;;  %v648_v10 = vld [vmem:[%s963_s3] ss:$0 sm:$0xff]  ;;  %v657_v47 = vld [vmem:[%s964_s4 + $0x38] sm:$0xff]  ;;  %v538_v63 = vld [vmem:[%s966_s6 + $0x8] sm:$0xff]  ;;  %s660_s0 = sld [smem:[#allocation2 + $0x1]]  ;;  %s829_s19 = smov [#allocation5]  }
  0x13   :  { %776 = vset.pattern.permute.xlu1 %v826_v18  ;;  %712 = vmatprep.mubr.msk.bf16.mxu0 %vm828_vm2, %v825_v9  ;;  %v654_v23 = vld [vmem:[%s964_s4 + $0x20] sm:$0xff]  ;;  %v278_v29 = vsub.s32 0, %v277_v27  ;;  %v756_v48 = vpack.c.bf16 %v657_v47, %v656_v46  ;;  %s636_s1 = sshll.u32 %s829_s19, 4  ;;  %s637_s1 = int_to_ptr.vmem [resolvable:$true] %s636_s1 }
  0x14   :  { %745 = vmatprep.subr.bf16.mxu1 %v744_v5  ;;  %v752_v25 = vpack.c.bf16 %v655_v24, %v654_v23  ;;  %v666_v38 = vld [vmem:[%s965_s5] sm:$0xff]   ;;  %p803_p6 = scmp.lt.s32.totalorder %s637_s1, %s637_s1 }
  0x15   :  { %747 = vmatpush3.bf16.msra.mxu1 %v744_v5  ;;  %v667_v39 = vunpack.c.l.bf16 %v666_v38  ;;  %v668_v40 = vunpack.c.h.bf16 %v666_v38  ;;  %v537_v62 = vld [vmem:[%s966_s6] sm:$0xff] }
  0x16   :  { %749 = vmatprep.subr.bf16.mxu1 %v748_v8  ;;  %v760_v0 = vpack.c.bf16 %v538_v63, %v537_v62  ;;  %v662_v24 = vld [vmem:[%s967_s7] ss:$0 sm:$0xff] }
  0x17   :  { %v283_v33 = vstv %s282_s27 }
  0x18   :  { %v482_v5 = vstv %s660_s0 }
  0x19   :  { %751 = vmatpush3.bf16.msra.mxu1 %v748_v8 }
  0x1a   :  { %727 = vmatprep.subr.bf16.mxu1 %v825_v9 }
  0xe5   :  { %v698_v11 = vpop.f32.mrb[0].mxu0 }
  0xe6   :  { %v133_v12 = vadd.f32 %v698_v11, %v648_v10  ;;  %v127_v13 = vpop.f32.mrb[1].mxu0 }
  0xe7   :  { %v128_v14 = vadd.f32 %v648_v10, %v127_v13 }
  0xe8   :  { %v137_v15 = vmax.f32 %v133_v12, 0.0 }
  0xe9   :  { %v136_v16 = vmax.f32 %v128_v14, 0.0 }
  0xea   :  { %v338_v53 = vmul.f32 0.3, %v137_v15 }
  0xeb   :  { %v291_v17 = vpack.c.bf16 %v137_v15, %v136_v16  ;;  %707 = vmatprep.mubr.msk.f32.mxu1 %vm146_vm1, %v136_v16  ;;  %v337_v49 = vmul.f32 0.3, %v136_v16  ;;  %v540_v16 = vld [vmem:[%s966_s6 + $0x18] sm:$0xff] }
  0xec   :  { %708 = vmatmul.mubr.msk.f32.vlgmr.msra.gmra.mrb[0].mxu1 %vm146_vm1, %v137_v15  ;;  %v539_v15 = vld [vmem:[%s966_s6 + $0x10] sm:$0xff]  ;;  %s798_s6 = scalar_lea.vmem %s637_s1, 256 }
  0xed   :  { %711 = vmatpush3.bf16.msra.mxu0 %v291_v17  ;;  %729 = vmatprep.mubr.msk.bf16.mxu1 %vm828_vm2, %v825_v9  ;;  %v764_v17 = vpack.c.bf16 %v540_v16, %v539_v15  ;;  %p799_p5 = scmp.ne.s32.totalorder %s637_s1, %s798_s6  ;;  %p804_p7 = scmp.lt.s32.totalorder %s798_s6, %s798_s6 }
  0xee   :  { %753 = vmatprep.subr.bf16.mxu0 %v752_v25 }
  0xef   :  { %p805_p8 = por %p804_p7, %p803_p6 }
  0xf1   :  { %p806_p9 = pnand %p805_p8, %p799_p5 }
 0x1bf   :  { %v709_v19 = vpop.f32.mrb[0].mxu1 }
 0x1c0   :  { %v219_v20 = vpop.f32.mrb[1].mxu1 }
 0x1c1   :  { %269 = vperm.xlu1 %776, %v219_v20   ;;  %230 = vrot.lane.b32.xlu0 %v219_v20, %s827_s23 }
 0x1c5   :  { %273 = vperm.xlu1 %776, %v709_v19   ;;  %232 = vrot.lane.b32.xlu0 %v709_v19, %s827_s23 }
 0x233   :  { %v231_v21 = vpop.permute.xlu0 %230 }
 0x234   :  { %236 = vxpose.xlu0.b32.start [1/2] (short) (narrow) %v231_v21, 8 }
 0x237   :  { %v233_v22 = vpop.permute.xlu0 %232 }
 0x238   :  { %237 = vxpose.xlu0.b32.end [2/2] (short) (narrow) %v233_v22, 8 }
 0x240   :  { %v270_v28 = vpop.permute.xlu1 %269 }
 0x244   :  { %v274_v32 = vpop.permute.xlu1 %273 }
 0x261   :  { %777 = vset.pattern.permute.xlu0 %v826_v18 }
 0x2b4   :  { %v252_v30 = vpop.trf.xlu0 }
 0x2b5   :  { %v279_v31 = vrot.slane %v252_v30, %v278_v29 }
 0x2b7   :  { %v280_v34 = vadd.f32 %v279_v31, %v270_v28  ;;  %v281_v35 = vadd.f32 %v279_v31, %v274_v32 }
 0x2b9   :  { %v284_v36 = vadd.f32 %v283_v33, %v280_v34  ;;  %v285_v37 = vadd.f32 %v283_v33, %v281_v35 }
 0x2bb   :  { %778 = vtanh.f32 %v284_v36 }
 0x2bc   :  { %780 = vtanh.f32 %v285_v37 }
 0x2c5   :  { %v779_v41 = vpop.eup %778 }
 0x2c6   :  { %v781_v42 = vpop.eup %780  ;;  %v288_v43 = vmul.f32 %v779_v41, %v667_v39 }
 0x2c7   :  { %v289_v44 = vmul.f32 %v781_v42, %v668_v40 }
 0x2c9   :  { %v290_v45 = vpack.c.bf16 %v289_v44, %v288_v43 }
 0x2cb   :  { %713 = vmatmul.mubr.msk.bf16.vlgmr.msra.gmra.mrb[4].mxu0 %vm292_vm3, %v290_v45 }
 0x2cc   :  { %755 = vmatpush3.bf16.msra.mxu0 %v752_v25 }
 0x2cd   :  { %757 = vmatprep.subr.bf16.mxu0 %v756_v48 }
 0x2d0   :  { %759 = vmatpush3.bf16.msra.mxu0 %v756_v48 }
 0x39e   :  { %v330_v50 = vpop.f32.mrb[4].mxu0 }
 0x39f   :  { %v339_v51 = vadd.f32 %v337_v49, %v330_v50  ;;  %v714_v52 = vpop.f32.mrb[5].mxu0 }
 0x3a0   :  { %v333_v54 = vpop.f32.mrb[6].mxu0 }
 0x3a1   :  { %v340_v55 = vadd.f32 %v338_v53, %v333_v54  ;;  %v715_v56 = vpop.f32.mrb[7].mxu0  ;;  %724 = vmatprep.mubr.msk.f32.mxu0 %vm146_vm1, %v339_v51 }
 0x3a3   :  { %v490_v57 = vpack.c.bf16 %v340_v55, %v339_v51  ;;  %725 = vmatmul.mubr.msk.f32.vlgmr.msra.gmra.mrb[2].mxu0 %vm146_vm1, %v340_v55 }
 0x3a5   :  { %728 = vmatpush3.bf16.msra.mxu1 %v490_v57 }
 0x3a6   :  { %761 = vmatprep.subr.bf16.mxu1 %v760_v0 }
 0x476   :  { %v726_v58 = vpop.f32.mrb[2].mxu0 }
 0x477   :  { %v418_v59 = vpop.f32.mrb[3].mxu0 }
 0x478   :  { %429 = vrot.lane.b32.xlu1 %v418_v59, %s827_s23 }
 0x47c   :  { %431 = vrot.lane.b32.xlu1 %v726_v58, %s827_s23 }
 0x480   :  { %472 = vperm.xlu1 %776, %v726_v58  }
 0x484   :  { %468 = vperm.xlu1 %776, %v418_v59  }
 0x4ea   :  { %v430_v60 = vpop.permute.xlu1 %429 }
 0x4eb   :  { %435 = vxpose.xlu1.b32.start [1/2] (short) (narrow) %v430_v60, 8 }
 0x4ee   :  { %v432_v61 = vpop.permute.xlu1 %431 }
 0x4ef   :  { %436 = vxpose.xlu1.b32.end [2/2] (short) (narrow) %v432_v61, 8 }
 0x4ff   :  { %v473_v1 = vpop.permute.xlu1 %472 }
 0x503   :  { %v469_v2 = vpop.permute.xlu1 %468 }
 0x56b   :  { %v451_v3 = vpop.trf.xlu1 }
 0x56c   :  { %v478_v4 = vrot.slane %v451_v3, %v278_v29 }
 0x56e   :  { %v479_v6 = vadd.f32 %v478_v4, %v469_v2  ;;  %v480_v7 = vadd.f32 %v478_v4, %v473_v1 }
 0x570   :  { %v483_v8 = vadd.f32 %v482_v5, %v479_v6  ;;  %v484_v9 = vadd.f32 %v482_v5, %v480_v7 }
 0x572   :  { %782 = vtanh.f32 %v483_v8 }
 0x573   :  { %784 = vtanh.f32 %v484_v9 }
 0x57c   :  { %v783_v10 = vpop.eup %782 }
 0x57d   :  { %v785_v11 = vpop.eup %784  ;;  %v487_v12 = vmul.f32 %v783_v10, %v667_v39 }
 0x57e   :  { %v488_v13 = vmul.f32 %v785_v11, %v668_v40 }
 0x580   :  { %v489_v14 = vpack.c.bf16 %v488_v13, %v487_v12 }
 0x582   :  { %730 = vmatmul.mubr.msk.bf16.vlgmr.msra.gmra.mrb[4].mxu1 %vm292_vm3, %v489_v14 }
 0x583   :  { %763 = vmatpush3.bf16.msra.mxu1 %v760_v0 }
 0x584   :  { %765 = vmatprep.subr.bf16.mxu1 %v764_v17 }
 0x587   :  { %767 = vmatpush3.bf16.msra.mxu1 %v764_v17 }
 0x655   :  { %v528_v18 = vpop.f32.mrb[4].mxu1 }
 0x656   :  { %v535_v19 = vadd.f32 %v528_v18, %v337_v49  ;;  %v731_v20 = vpop.f32.mrb[5].mxu1 }
 0x657   :  { %v531_v21 = vpop.f32.mrb[6].mxu1 }
 0x658   :  { %v536_v22 = vadd.f32 %v531_v21, %v338_v53  ;;  %v732_v23 = vpop.f32.mrb[7].mxu1  ;;  %741 = vmatprep.mubr.msk.f32.mxu1 %vm146_vm1, %v535_v19 }
 0x65a   :  { %742 = vmatmul.mubr.msk.f32.vlgmr.msra.gmra.mrb[2].mxu1 %vm146_vm1, %v536_v22 }
 0x72d   :  { %v743_v25 = vpop.f32.mrb[2].mxu1 }
 0x72e   :  { %v626_v26 = vadd.f32 %v743_v25, %v662_v24  ;;  %v620_v27 = vpop.f32.mrb[3].mxu1 }
 0x72f   :  { %v621_v28 = vadd.f32 %v662_v24, %v620_v27 }
 0x730   :  { %630 = vst.msk [vmem:[#allocation5 + $0x8] sm:$0xff] %vm146_vm1, %v626_v26 }
 0x731   :  { %629 = vst.msk [vmem:[#allocation5] sm:$0xff] %vm146_vm1, %v621_v28 }
 0x732   :  { %809 = shalt.err (!%p806_p9)
}
 0x733   :  { %s810_s21 = scalar_lea.hbm %s968_s8, 256 }
 0x734   :  { %p811_p10 = scmp.ne.s32.totalorder %s968_s8, %s810_s21  ;;  %p814_p11 = scmp.lt.u32.totalorder %s810_s21, %s968_s8 }
 0x736   :  { %p816_p12 = pnand %p814_p11, %p811_p10 }
 0x738   :  { %819 = shalt.err (!%p816_p12)
}
 0x739   :  { %s830_s25 = smov 128   ;;  %s831_s26 = smov 8  }
 0x73a   :  { %642 = dma.vmem_to_hbm [thread:$0]  %s637_s1, 256, %s968_s8, [#allocation3], %s830_s25, %s830_s25, %s831_s26  }
 0x73b   :  { %822 = dma.done.wait [#allocation3], 256  }
 0x73c   :  { %823 = vsyncadd [#allocation3], 4294967040 }
 0x73d   :  { %646 = vsyncpa [#allocation3], 1 }
 0x73e   :  { %647 = vsyncpa [#allocation4], 1 }

</bundles_post_ra>
